<compile_context>
chip_gen: v7x
topology: tpu7x:2x2x1
jax: 0.10.0
libtpu: 0.0.40
codegen_flags: <defaults>
</compile_context>

<pallas_src>
import jax
import jax.numpy as jnp
from jax.experimental import pallas as pl
from jax.experimental.pallas import tpu as pltpu

DIM = 32      # input feature dim (module's `dim`)
H1 = 80       # fc_1 out_features
H2 = 10       # fc_2 out_features
H3 = 1        # fc_3 out_features


def mlp_kernel(x_ref, w1_ref, b1_ref, w2_ref, b2_ref, w3c_ref, b3_ref, o_ref):
    # x_ref: (tile_n, DIM) bf16, natural row-major layout.
    # fc_1: contract the shared DIM axis of W1 (H1, DIM) and x (tile_n, DIM)
    # so the result (H1, tile_n) keeps rows on lanes without any transpose.
    h1 = jax.lax.dot_general(
        w1_ref[...], x_ref[...],
        dimension_numbers=(((1,), (1,)), ((), ())),
        preferred_element_type=jnp.float32)                  # (H1, tile_n) f32 acc
    h1 = jnp.maximum(h1 + b1_ref[...], 0.0)                  # bias + ReLU
    # dropout = identity in eval mode.
    # TODO(synk): training-mode dropout would use pltpu.prng_seed(seed ^ pl.program_id(0))
    #             + pltpu.prng_random_bits to draw a per-tile mask * 1/(1-p).
    h1 = h1.astype(jnp.bfloat16)                             # bf16 into the next MXU op

    # fc_2 + ReLU -> (H2, tile_n)
    h2 = jnp.dot(w2_ref[...], h1, preferred_element_type=jnp.float32)
    h2 = jnp.maximum(h2 + b2_ref[...], 0.0)

    # fc_3: M=1, K=10 -> VPU multiply + 10-sublane reduce instead of a full MXU pass.
    out = jnp.sum(w3c_ref[...] * h2, axis=0, keepdims=True) + b3_ref[...]
    o_ref[...] = out.astype(o_ref.dtype)                     # (1, tile_n) lane-dense


def mlp_forward(x, params, *, tile_n=4096):
    """x: (N, DIM) natural layout (any float dtype).  Returns (N,) float32.

    tile_n: rows per grid step, multiple of 128.  Sweep 4096-16384 in production;
    per-step footprint (double-buffered bf16 x tile + f32 (80, tile_n) intermediate)
    stays well inside the explicit 32 MiB VMEM limit even at 16384, which is safe
    on v5e (16 MiB default scoped), v6e (32 MiB default) and v7x (64 MiB physical).
    """
    w1, b1, w2, b2, w3, b3 = params
    N, dim = x.shape
    assert dim == DIM and w1.shape == (H1, DIM), (x.shape, w1.shape)
    assert tile_n % 128 == 0, "tile_n must be a multiple of the 128-lane width"

    num_tiles = pl.cdiv(N, tile_n)      # ragged tail handled as a partial x block
    n_pad = num_tiles * tile_n          # only the tiny (1, n_pad) output is padded

    # bf16 operands for the MXU and half the dominant HBM read of x.  (Ideally x is
    # already produced as bf16 upstream; the cast here is the self-contained fallback.)
    x_bf = x.astype(jnp.bfloat16)
    w1_bf = w1.astype(jnp.bfloat16)
    w2_bf = w2.astype(jnp.bfloat16)
    w3_col = w3.T.astype(jnp.float32)   # (H2, 1): fc_3 runs on the VPU in f32

    cost = pl.CostEstimate(
        flops=2 * N * (H1 * DIM + H2 * H1 + H2),
        transcendentals=0,
        bytes_accessed=N * DIM * 2 + N * 4
        + (H1 * DIM + H2 * H1) * 2 + (H1 + H2 + H2 + H3) * 4,
    )

    out = pl.pallas_call(
        mlp_kernel,
        out_shape=jax.ShapeDtypeStruct((H3, n_pad), jnp.float32),
        grid_spec=pltpu.PrefetchScalarGridSpec(
            num_scalar_prefetch=0,
            grid=(num_tiles,),
            in_specs=[
                # Streaming x tile in its natural (tile_n, DIM) layout; DIM is the
                # full last dim so each block's HBM read is fully contiguous.
                # If xprof shows exposed DMA, add pipeline_mode=pl.Buffered(3) here.
                pl.BlockSpec((tile_n, DIM), lambda i: (i, 0)),
                pl.BlockSpec((H1, DIM), lambda i: (0, 0)),   # W1 (out, in), bf16
                pl.BlockSpec((H1, 1), lambda i: (0, 0)),     # b1, f32
                pl.BlockSpec((H2, H1), lambda i: (0, 0)),    # W2, bf16
                pl.BlockSpec((H2, 1), lambda i: (0, 0)),     # b2, f32
                pl.BlockSpec((H2, 1), lambda i: (0, 0)),     # w3 column, f32 (VPU path)
                pl.BlockSpec((H3, 1), lambda i: (0, 0)),     # b3, f32
            ],
            out_specs=pl.BlockSpec((H3, tile_n), lambda i: (0, i)),
        ),
        compiler_params=pltpu.CompilerParams(
            dimension_semantics=("parallel",),   # row tiles shard across TCs on v7x
            vmem_limit_bytes=32 * 1024 * 1024,
        ),
        cost_estimate=cost,
    )(x_bf, w1_bf, b1, w2_bf, b2, w3_col, b3)

    # TODO(synk): if a bundle dump still shows MXU-bound on v6e/v7x after bf16,
    #             pack W1 block-diagonally (240x96) at init to raise MXU array fill ~3x.

    # (1, n_pad) -> (N,): the .squeeze(dim=1) of the original module; padded tail
    # columns (garbage from the partial last x block) never reach the caller.
    return out[0, :N]


def init_params(key, dim):
    """Deterministic init mimicking nn.Linear: W (out, in), b (out, 1), all f32."""
    def linear(key, fan_in, fan_out):
        kw, kb = jax.random.split(key)
        bound = 1.0 / jnp.sqrt(fan_in)
        w = jax.random.uniform(kw, (fan_out, fan_in), jnp.float32, -bound, bound)
        b = jax.random.uniform(kb, (fan_out, 1), jnp.float32, -bound, bound)
        return w, b

    k1, k2, k3 = jax.random.split(key, 3)
    w1, b1 = linear(k1, dim, H1)
    w2, b2 = linear(k2, H1, H2)
    w3, b3 = linear(k3, H2, H3)
    return (w1, b1, w2, b2, w3, b3)


def mlp_ref(x, params):
    """Pure-JAX f32 reference (natural (N, DIM) layout) for correctness check."""
    w1, b1, w2, b2, w3, b3 = params
    h = jnp.maximum(x @ w1.T + b1[:, 0], 0.0)
    h = jnp.maximum(h @ w2.T + b2[:, 0], 0.0)
    return (h @ w3.T + b3[:, 0])[:, 0]


if __name__ == "__main__":
    key = jax.random.PRNGKey(0)
    kx, kp = jax.random.split(key)

    # Ragged N on purpose: exercises the partial last block, and gives 2 grid tiles
    # so the "parallel" axis can actually use both v7x TensorCores.
    N = 1000
    x = jax.random.normal(kx, (N, DIM), jnp.float32)   # natural (N, DIM) layout
    params = init_params(kp, DIM)

    out = mlp_forward(x, params, tile_n=512)
    out = jax.block_until_ready(out)

    ref = mlp_ref(x, params)
    assert out.shape == (N,), out.shape
    # bf16 MXU operands (f32 accumulation) => loosened tolerance vs the f32 reference.
    assert jnp.allclose(out, ref, atol=3e-2, rtol=3e-2), float(jnp.max(jnp.abs(out - ref)))

    print("KERNEL_OK")
</pallas_src>

<mosaic_0001>
module attributes {stable_mosaic.version = 11 : i64} {
  func.func @mlp_kernel(%arg0: i32, %arg1: memref<512x32xbf16, #tpu.memory_space<vmem>>, %arg2: memref<80x32xbf16, #tpu.memory_space<vmem>>, %arg3: memref<80x1xf32, #tpu.memory_space<vmem>>, %arg4: memref<10x80xbf16, #tpu.memory_space<vmem>>, %arg5: memref<10x1xf32, #tpu.memory_space<vmem>>, %arg6: memref<10x1xf32, #tpu.memory_space<vmem>>, %arg7: memref<1x1xf32, #tpu.memory_space<vmem>>, %arg8: memref<1x512xf32, #tpu.memory_space<vmem>>) attributes {dimension_semantics = [#tpu.dimension_semantics<parallel>], iteration_bounds = array<i64: 2>, scalar_prefetch = 0 : i64, scratch_operands = 0 : i64, tpu.core_type = #tpu.core_type<tc>, window_params = [{transform_indices = @transform_0, window_bounds = array<i64: 512, 32>}, {pipeline_mode = #tpu.pipeline_mode<synchronous>, transform_indices = @transform_1, window_bounds = array<i64: 80, 32>}, {pipeline_mode = #tpu.pipeline_mode<synchronous>, transform_indices = @transform_2, window_bounds = array<i64: 80, 1>}, {pipeline_mode = #tpu.pipeline_mode<synchronous>, transform_indices = @transform_3, window_bounds = array<i64: 10, 80>}, {pipeline_mode = #tpu.pipeline_mode<synchronous>, transform_indices = @transform_4, window_bounds = array<i64: 10, 1>}, {pipeline_mode = #tpu.pipeline_mode<synchronous>, transform_indices = @transform_5, window_bounds = array<i64: 10, 1>}, {pipeline_mode = #tpu.pipeline_mode<synchronous>, transform_indices = @transform_6, window_bounds = array<i64: 1, 1>}, {transform_indices = @transform_7, window_bounds = array<i64: 1, 512>}]} {
    %c0 = arith.constant 0 : index
    %c0_0 = arith.constant 0 : index
    %0 = vector.load %arg2[%c0, %c0_0] : memref<80x32xbf16, #tpu.memory_space<vmem>>, vector<80x32xbf16>
    %c0_1 = arith.constant 0 : index
    %c0_2 = arith.constant 0 : index
    %1 = vector.load %arg1[%c0_1, %c0_2] : memref<512x32xbf16, #tpu.memory_space<vmem>>, vector<512x32xbf16>
    %cst = arith.constant dense<0.000000e+00> : vector<80x512xf32>
    %2 = tpu.matmul %0, %1, %cst {dimension_numbers = #tpu.dot_dimension_numbers<[1], [1], [0], [0], [0, 0, 1, 0], [], []>} : vector<80x32xbf16>, vector<512x32xbf16>, vector<80x512xf32> -> vector<80x512xf32>
    %c0_3 = arith.constant 0 : index
    %c0_4 = arith.constant 0 : index
    %3 = vector.load %arg3[%c0_3, %c0_4] : memref<80x1xf32, #tpu.memory_space<vmem>>, vector<80x1xf32>
    %4 = vector.broadcast %3 : vector<80x1xf32> to vector<80x512xf32>
    %5 = arith.addf %2, %4 : vector<80x512xf32>
    %cst_5 = arith.constant 0.000000e+00 : f32
    %6 = vector.broadcast %cst_5 : f32 to vector<80x512xf32>
    %7 = arith.maximumf %5, %6 : vector<80x512xf32>
    %8 = arith.truncf %7 : vector<80x512xf32> to vector<80x512xbf16>
    %c0_6 = arith.constant 0 : index
    %c0_7 = arith.constant 0 : index
    %9 = vector.load %arg4[%c0_6, %c0_7] : memref<10x80xbf16, #tpu.memory_space<vmem>>, vector<10x80xbf16>
    %cst_8 = arith.constant dense<0.000000e+00> : vector<10x512xf32>
    %10 = tpu.matmul %9, %8, %cst_8 {dimension_numbers = #tpu.dot_dimension_numbers<[1], [0], [0], [1], [0, 0, 1, 1], [], []>} : vector<10x80xbf16>, vector<80x512xbf16>, vector<10x512xf32> -> vector<10x512xf32>
    %c0_9 = arith.constant 0 : index
    %c0_10 = arith.constant 0 : index
    %11 = vector.load %arg5[%c0_9, %c0_10] : memref<10x1xf32, #tpu.memory_space<vmem>>, vector<10x1xf32>
    %12 = vector.broadcast %11 : vector<10x1xf32> to vector<10x512xf32>
    %13 = arith.addf %10, %12 : vector<10x512xf32>
    %cst_11 = arith.constant 0.000000e+00 : f32
    %14 = vector.broadcast %cst_11 : f32 to vector<10x512xf32>
    %15 = arith.maximumf %13, %14 : vector<10x512xf32>
    %c0_12 = arith.constant 0 : index
    %c0_13 = arith.constant 0 : index
    %16 = vector.load %arg6[%c0_12, %c0_13] : memref<10x1xf32, #tpu.memory_space<vmem>>, vector<10x1xf32>
    %17 = vector.broadcast %16 : vector<10x1xf32> to vector<10x512xf32>
    %18 = arith.mulf %17, %15 : vector<10x512xf32>
    %cst_14 = arith.constant dense<0.000000e+00> : vector<512xf32>
    %19 = vector.multi_reduction <add>, %18, %cst_14 [0] : vector<10x512xf32> to vector<512xf32>
    %20 = vector.shape_cast %19 : vector<512xf32> to vector<1x512xf32>
    %c0_15 = arith.constant 0 : index
    %c0_16 = arith.constant 0 : index
    %21 = vector.load %arg7[%c0_15, %c0_16] : memref<1x1xf32, #tpu.memory_space<vmem>>, vector<1x1xf32>
    %22 = vector.broadcast %21 : vector<1x1xf32> to vector<1x512xf32>
    %23 = arith.addf %20, %22 : vector<1x512xf32>
    %c0_17 = arith.constant 0 : index
    %c0_18 = arith.constant 0 : index
    %24 = vector.load %arg8[%c0_17, %c0_18] : memref<1x512xf32, #tpu.memory_space<vmem>>, vector<1x512xf32>
    tpu.vector_store %arg8[%c0_17, %c0_18], %23 {strides = array<i32>} : memref<1x512xf32, #tpu.memory_space<vmem>>, vector<1x512xf32>,
    return
  }
  func.func @transform_0(%arg0: i32) -> (i32, i32) {
    %c0_i32 = arith.constant 0 : i32
    %c0_i32_0 = arith.constant 0 : i32
    return %arg0, %c0_i32 : i32, i32
  }
  func.func @transform_1(%arg0: i32) -> (i32, i32) {
    %c0_i32 = arith.constant 0 : i32
    %c0_i32_0 = arith.constant 0 : i32
    %c0_i32_1 = arith.constant 0 : i32
    return %c0_i32, %c0_i32_0 : i32, i32
  }
  func.func @transform_2(%arg0: i32) -> (i32, i32) {
    %c0_i32 = arith.constant 0 : i32
    %c0_i32_0 = arith.constant 0 : i32
    %c0_i32_1 = arith.constant 0 : i32
    return %c0_i32, %c0_i32_0 : i32, i32
  }
  func.func @transform_3(%arg0: i32) -> (i32, i32) {
    %c0_i32 = arith.constant 0 : i32
    %c0_i32_0 = arith.constant 0 : i32
    %c0_i32_1 = arith.constant 0 : i32
    return %c0_i32, %c0_i32_0 : i32, i32
  }
  func.func @transform_4(%arg0: i32) -> (i32, i32) {
    %c0_i32 = arith.constant 0 : i32
    %c0_i32_0 = arith.constant 0 : i32
    %c0_i32_1 = arith.constant 0 : i32
    return %c0_i32, %c0_i32_0 : i32, i32
  }
  func.func @transform_5(%arg0: i32) -> (i32, i32) {
    %c0_i32 = arith.constant 0 : i32
    %c0_i32_0 = arith.constant 0 : i32
    %c0_i32_1 = arith.constant 0 : i32
    return %c0_i32, %c0_i32_0 : i32, i32
  }
  func.func @transform_6(%arg0: i32) -> (i32, i32) {
    %c0_i32 = arith.constant 0 : i32
    %c0_i32_0 = arith.constant 0 : i32
    %c0_i32_1 = arith.constant 0 : i32
    return %c0_i32, %c0_i32_0 : i32, i32
  }
  func.func @transform_7(%arg0: i32) -> (i32, i32) {
    %c0_i32 = arith.constant 0 : i32
    %c0_i32_0 = arith.constant 0 : i32
    return %c0_i32, %arg0 : i32, i32
  }
}

</mosaic_0001>

<bundles_post_ra>
// kernel: tpu_custom_call.1
= control target key start
LH: loop header
LB: loop body
LE: loop exit
PB: predicated region body
PF: predicated region fallthrough
CT: control target
= control target key end

     0   :  { %s1833_s0 = inlined_call_operand.vmem [shape: bf16[1000,32], index: 0, kind: input, shape index: {}]   ;;  %s1834_s1 = inlined_call_operand.vmem [shape: bf16[80,32], index: 1, kind: input, shape index: {}]   ;;  %s1835_s2 = inlined_call_operand.vmem [shape: f32[80,1], index: 2, kind: input, shape index: {}]   ;;  %s1836_s3 = inlined_call_operand.vmem [shape: bf16[10,80], index: 3, kind: input, shape index: {}]   ;;  %s1837_s4 = inlined_call_operand.vmem [shape: f32[10,1], index: 4, kind: input, shape index: {}]   ;;  %s1838_s5 = inlined_call_operand.vmem [shape: f32[10,1], index: 5, kind: input, shape index: {}]   ;;  %s1839_s6 = inlined_call_operand.<no memory space> [shape: f32[1,1], index: 6, kind: input, shape index: {}]   ;;  %s1840_s7 = inlined_call_operand.hbm [shape: f32[1,1024], index: 7, kind: output, shape index: {}]  }
   0x1   :  { %v12_v0 = vstv %s1839_s6 }
   0x2   :  { %13 = vst [vmem:[#allocation2] sm:$0x1] %v12_v0 }
   0x3   :  { %14 = vsyncpa [#allocation4], 0 }
   0x4   :  { %16 = vsyncpa [#allocation4 + $0x1], 0  ;;  %s1574_s26 = smov 0   ;;  %s1576_s27 = smov 0  }
   0x5   :  { %s1578_s28 = smov 0   ;;  %s1580_s29 = smov 0  }
   0x6 LB: > { %s1251_s6 = sadd.s32 4294967295, %s1526_s29   ;;  %s1252_s30 = sadd.s32 4294967294, %s1526_s29   ;;  %s1526_s29 = sphi %s1580_s29, %s1846_s29   ;;  %s1522_s28 = sphi %s1578_s28, %s1845_s28   ;;  %s1518_s27 = sphi %s1576_s27, %s1844_s27   ;;  %s1514_s26 = sphi %s1574_s26, %s1843_s26  }
   0x7   : > { %s1597_s8 = sadd.s32 1, %s1526_s29   ;;  %s181_s9 = sadd.s32 1, %s1522_s28 }
   0x8   : > { %s178_s10 = ssub.s32 %s1526_s29, %s1597_s8  ;;  %p191_p0 = scmp.ne.s32.totalorder %s1522_s28, %s1518_s27 }
   0x9   : > { %p179_p1 = scmp.eq.s32.totalorder %s178_s10, 0  ;;  %p192_p2 = scmp.eq.s32.totalorder %s1251_s6, 1 }
   0xa   : > { %p197_p3 = scmp.ne.s32.totalorder %s1518_s27, %s1514_s26  ;;  %p198_p4 = scmp.eq.s32.totalorder %s1252_s30, 1 }
   0xb   : > { %s1607_s11 = scalar_select %p179_p1, %s1522_s28, %s181_s9  }
   0xc   : > { %p1609_p5 = por %p192_p2, %p191_p0  ;;  %p1613_p6 = por %p198_p4, %p197_p3 }
   0xd   : > { %p1255_p7 = scmp.ge.s32.totalorder %s1526_s29, 1  ;;  %p251_p8 = scmp.lt.s32.totalorder %s1526_s29, 3 }
   0xf   : > { %p252_p9 = pnand %p1255_p7, %p251_p8 }
  0x10   : > { %s1619_s14 = sshll.u32 (!%p252_p9), %s1251_s6, 6  ;;  %v1625_v1 = vld [vmem:[%s1834_s1] sm:$0xff] (!%p252_p9)   ;;  %vm622_vm0 = vcmask (!%p252_p9), 261120   ;;  %v1528_v2 = vmov (!%p252_p9), 0   ;;  %v378_v4 = vld [vmem:[%s1835_s2 + $0x8] sm:$0xff] (!%p252_p9)  ;;  %v379_v5 = vld [vmem:[%s1835_s2 + $0x10] sm:$0xff] (!%p252_p9) }
  0x11   : > { %255 = sbr.rel (%p252_p9) target bundleno = 613 (0x265), region = 48  ;;  %p292_p10 = scmp.lt.s32.totalorder (!%p252_p9), %s1619_s14, 124  ;;  %1331 = vmatprep.mubr.msk.bf16.mxu0 (!%p252_p9), %vm622_vm0, %v1625_v1  ;;  %1357 = vmatprep.mubr.msk.bf16.mxu1 (!%p252_p9), %vm622_vm0, %v1625_v1  ;;  %v377_v3 = vld [vmem:[%s1835_s2] sm:$0xff] (!%p252_p9)  ;;  %v383_v17 = vld [vmem:[%s1835_s2 + $0x30] sm:$0xff] (!%p252_p9)  ;;  %v380_v36 = vld [vmem:[%s1835_s2 + $0x18] sm:$0xff] (!%p252_p9)  ;;  %vm979_vm1 = vcmask (!%p252_p9), 654336  }
  0x12   : > { %1424 = vset.pattern.permute.xlu0 (!%p252_p9), %v1528_v2  ;;  %1425 = vset.pattern.permute.xlu1 (!%p252_p9), %v1528_v2  ;;  %v381_v9 = vld [vmem:[%s1835_s2 + $0x20] sm:$0xff] (!%p252_p9)  ;;  %v382_v40 = vld [vmem:[%s1835_s2 + $0x28] sm:$0xff] (!%p252_p9)  ;;  %v384_v45 = vld [vmem:[%s1835_s2 + $0x38] sm:$0xff] (!%p252_p9)  ;;  %vm1097_vm2 = vcmask (!%p252_p9), 1041408   ;;  %s284_s16 = sand.u32 (!%p252_p9), 1, %s1518_s27   ;;  %s1791_s22 = scalar_lea.hbm (!%p252_p9), %s1840_s7, %s1619_s14 }
  0x13   : > { %389 = vperm.xlu0 (!%p252_p9), %1424, %v377_v3   ;;  %399 = vperm.xlu1 (!%p252_p9), %1425, %v379_v5   ;;  %v385_v37 = vld [vmem:[%s1835_s2 + $0x40] sm:$0xff] (!%p252_p9)  ;;  %v963_v43 = vld [vmem:[%s1837_s4 + $0x8] sm:$0x3] (!%p252_p9)  ;;  %v1460_v5 = vld [vmem:[%s1834_s1 + $0x10] sm:$0xff] (!%p252_p9)   ;;  %s1530_s25 = smov (!%p252_p9), [#allocation3]  }
  0x14   : > { %v1078_v47 = vld [vmem:[%s1838_s5 + $0x8] sm:$0x3] (!%p252_p9)  ;;  %v1130_v53 = vld [vmem:[#allocation2] sm:$0x1] (!%p252_p9)  ;;  %s1468_s6 = sshll.u32 (!%p252_p9), %s1530_s25, 4  ;;  %s1469_s6 = int_to_ptr.vmem [resolvable:$false] %s1468_s6 }
  0x15   : > { %v386_v50 = vld [vmem:[%s1835_s2 + $0x48] sm:$0xff] (!%p252_p9)  ;;  %v962_v55 = vld [vmem:[%s1837_s4] sm:$0xff] (!%p252_p9)  ;;  %s1470_s30 = scalar_lea.vmem (!%p252_p9), %s1469_s6, 128 }
  0x16   : > { %v1077_v59 = vld [vmem:[%s1838_s5] sm:$0xff] (!%p252_p9) }
  0x17   : > { %394 = vperm.xlu0 (!%p252_p9), %1424, %v378_v4   ;;  %404 = vperm.xlu1 (!%p252_p9), %1425, %v380_v36   ;;  %v1459_v4 = vld [vmem:[%s1834_s1 + $0x8] sm:$0xff] (!%p252_p9)  }
  0x18   : > { %s293_s17 = scalar_select %p292_p10, %s1619_s14, 124 }
  0x1a   : > { %s1258_s18 = sshll.u32 %s293_s17, 2  ;;  %s1256_s17 = sshll.u32 %s284_s16, 2 }
  0x1b   : > { %s1640_s23 = scalar_lea.vmem %s1833_s0, %s1258_s18  ;;  %409 = vperm.xlu0 %1424, %v381_v9   ;;  %414 = vperm.xlu1 %1425, %v382_v40   ;;  %s286_s18 = scalar_lea.vmem [#allocation3], %s1256_s17 }
  0x1c   : > { %v1426_v6 = vld [vmem:[%s1640_s23 + $0x40] sm:$0xff]   ;;  %v1430_v12 = vld [vmem:[%s1640_s23 + $0x48] sm:$0xff]   ;;  %v1434_v19 = vld [vmem:[%s1640_s23 + $0x50] sm:$0xff]   ;;  %s1193_s19 = sshll.u32 %s286_s18, 4  ;;  %s1793_s19 = int_to_ptr.vmem [resolvable:$true] %s1193_s19 }
  0x1d   : > { %v1427_v7 = vld [vmem:[%s1640_s23 + $0xc0] sm:$0xff]   ;;  %1367 = vmatprep.subr.msk.bf16.mxu0 %vm622_vm0, %v1426_v6  ;;  %v1431_v14 = vld [vmem:[%s1640_s23 + $0xc8] sm:$0xff]   ;;  %v1435_v21 = vld [vmem:[%s1640_s23 + $0xd0] sm:$0xff]   ;;  %s1464_s24 = scalar_lea.vmem %s1793_s19, 64  ;;  %p1471_p0 = scmp.lt.s32.totalorder %s1793_s19, %s1469_s6 }
  0x1e   : > { %v1428_v8 = vld [vmem:[%s1640_s23] sm:$0xff]   ;;  %1375 = vmatprep.subr.msk.bf16.mxu1 %vm622_vm0, %v1427_v7  ;;  %v1432_v15 = vld [vmem:[%s1640_s23 + $0x8] sm:$0xff]   ;;  %v1436_v22 = vld [vmem:[%s1640_s23 + $0x10] sm:$0xff]   ;;  %p1465_p11 = scmp.ne.s32.totalorder %s1793_s19, %s1464_s24  ;;  %p1472_p1 = scmp.lt.s32.totalorder %s1470_s30, %s1464_s24 }
  0x1f   : > { %v1429_v10 = vld [vmem:[%s1640_s23 + $0x80] sm:$0xff]   ;;  %v639_v11 = vsel %vm622_vm0, %v1428_v8, 0  ;;  %v1433_v16 = vld [vmem:[%s1640_s23 + $0x88] sm:$0xff]   ;;  %v642_v18 = vsel %vm622_vm0, %v1432_v15, 0  ;;  %419 = vperm.xlu0 %1424, %v383_v17   ;;  %v1437_v23 = vld [vmem:[%s1640_s23 + $0x90] sm:$0xff]   ;;  %v645_v24 = vsel %vm622_vm0, %v1436_v22, 0  ;;  %424 = vperm.xlu1 %1425, %v384_v45  }
  0x20   : > { %1316 = vmatpush3.bf16.xpose.msra.mxu0 %v639_v11  ;;  %v687_v13 = vsel %vm622_vm0, %v1429_v10, 0  ;;  %v690_v20 = vsel %vm622_vm0, %v1433_v16, 0  ;;  %v1438_v25 = vld [vmem:[%s1640_s23 + $0x58] sm:$0xff]   ;;  %v693_v26 = vsel %vm622_vm0, %v1437_v23, 0  ;;  %v1442_v31 = vld [vmem:[%s1640_s23 + $0x60] sm:$0xff]   ;;  %v1446_v39 = vld [vmem:[%s1640_s23 + $0x68] sm:$0xff]   ;;  %p1466_p12 = pnand %p1465_p11, %p1609_p5  ;;  %p1473_p2 = por %p1472_p1, %p1471_p0 }
  0x21   : > { %1342 = vmatpush3.bf16.xpose.msra.mxu1 %v687_v13  ;;  %1368 = vmatprep.subr.msk.bf16.mxu0 %vm622_vm0, %v1430_v12  ;;  %v1439_v27 = vld [vmem:[%s1640_s23 + $0xd8] sm:$0xff]   ;;  %v1443_v33 = vld [vmem:[%s1640_s23 + $0xe0] sm:$0xff]   ;;  %v1447_v42 = vld [vmem:[%s1640_s23 + $0xe8] sm:$0xff]  }
  0x22   : > { %1376 = vmatprep.subr.msk.bf16.mxu1 %vm622_vm0, %v1431_v14  ;;  %v1440_v28 = vld [vmem:[%s1640_s23 + $0x18] sm:$0xff]   ;;  %v1444_v34 = vld [vmem:[%s1640_s23 + $0x20] sm:$0xff]   ;;  %v1448_v44 = vld [vmem:[%s1640_s23 + $0x28] sm:$0xff]   ;;  %p1467_p13 = pneg %p1466_p12 }
  0x23   : > { %v1441_v29 = vld [vmem:[%s1640_s23 + $0x98] sm:$0xff]   ;;  %v648_v30 = vsel %vm622_vm0, %v1440_v28, 0  ;;  %v1445_v35 = vld [vmem:[%s1640_s23 + $0xa0] sm:$0xff]   ;;  %429 = vperm.xlu0 %1424, %v385_v37   ;;  %v651_v38 = vsel %vm622_vm0, %v1444_v34, 0  ;;  %v1449_v46 = vld [vmem:[%s1640_s23 + $0xa8] sm:$0xff]   ;;  %v654_v48 = vsel %vm622_vm0, %v1448_v44, 0  ;;  %434 = vperm.xlu1 %1425, %v386_v50  }
  0x24   : > { %v696_v32 = vsel %vm622_vm0, %v1441_v29, 0  ;;  %v699_v41 = vsel %vm622_vm0, %v1445_v35, 0  ;;  %v1450_v49 = vld [vmem:[%s1640_s23 + $0x70] sm:$0xff]   ;;  %v702_v51 = vsel %vm622_vm0, %v1449_v46, 0  ;;  %v1454_v58 = vld [vmem:[%s1640_s23 + $0x78] sm:$0xff]   ;;  %v1462_v6 = vld [vmem:[%s1834_s1 + $0x20] sm:$0xff]   ;;  %p1474_p3 = pnand %p1473_p2, %p1467_p13 }
  0x25   : > { %v1451_v52 = vld [vmem:[%s1640_s23 + $0xf0] sm:$0xff]   ;;  %v1455_v61 = vld [vmem:[%s1640_s23 + $0xf8] sm:$0xff]  }
  0x26   : > { %v1452_v54 = vld [vmem:[%s1640_s23 + $0x30] sm:$0xff]   ;;  %v1456_v62 = vld [vmem:[%s1640_s23 + $0x38] sm:$0xff]  }
  0x27   : > { %971 = vperm.xlu0 %1424, %v963_v43   ;;  %v1453_v56 = vld [vmem:[%s1640_s23 + $0xb0] sm:$0xff]   ;;  %966 = vperm.xlu1 %1425, %v962_v55   ;;  %v657_v57 = vsel %vm622_vm0, %v1452_v54, 0  ;;  %v1457_v63 = vld [vmem:[%s1640_s23 + $0xb8] sm:$0xff]   ;;  %v660_v0 = vsel %vm622_vm0, %v1456_v62, 0  ;;  %s1179_s23 = scalar_lea.sflag [#allocation4], %s284_s16 }
  0x28   : > { %1318 = vmatpush3.bf16.xpose.msra.mxu0 %v642_v18  ;;  %v705_v60 = vsel %vm622_vm0, %v1453_v56, 0  ;;  %v708_v3 = vsel %vm622_vm0, %v1457_v63, 0 }
  0x29   : > { %1344 = vmatpush3.bf16.xpose.msra.mxu1 %v690_v20  ;;  %1369 = vmatprep.subr.msk.bf16.mxu0 %vm622_vm0, %v1434_v19 }
  0x2a   : > { %1377 = vmatprep.subr.msk.bf16.mxu1 %vm622_vm0, %v1435_v21 }
  0x2b   : > { %1086 = vperm.xlu0 %1424, %v1078_v47   ;;  %1081 = vperm.xlu1 %1425, %v1077_v59  }
  0x2f   : > { %1133 = vperm.xlu0 %1424, %v1130_v53  }
  0x30   : > { %1320 = vmatpush3.bf16.xpose.msra.mxu0 %v645_v24 }
  0x31   : > { %1346 = vmatpush3.bf16.xpose.msra.mxu1 %v693_v26  ;;  %1370 = vmatprep.subr.msk.bf16.mxu0 %vm622_vm0, %v1438_v25 }
  0x32   : > { %1378 = vmatprep.subr.msk.bf16.mxu1 %vm622_vm0, %v1439_v27 }
  0x38   : > { %1322 = vmatpush3.bf16.xpose.msra.mxu0 %v648_v30 }
  0x39   : > { %1348 = vmatpush3.bf16.xpose.msra.mxu1 %v696_v32  ;;  %1371 = vmatprep.subr.msk.bf16.mxu0 %vm622_vm0, %v1442_v31 }
  0x3a   : > { %1379 = vmatprep.subr.msk.bf16.mxu1 %vm622_vm0, %v1443_v33 }
  0x40   : > { %1324 = vmatpush3.bf16.xpose.msra.mxu0 %v651_v38 }
  0x41   : > { %1350 = vmatpush3.bf16.xpose.msra.mxu1 %v699_v41  ;;  %1372 = vmatprep.subr.msk.bf16.mxu0 %vm622_vm0, %v1446_v39 }
  0x42   : > { %1380 = vmatprep.subr.msk.bf16.mxu1 %vm622_vm0, %v1447_v42 }
  0x48   : > { %1326 = vmatpush3.bf16.xpose.msra.mxu0 %v654_v48 }
  0x49   : > { %1352 = vmatpush3.bf16.xpose.msra.mxu1 %v702_v51  ;;  %1373 = vmatprep.subr.msk.bf16.mxu0 %vm622_vm0, %v1450_v49 }
  0x4a   : > { %1381 = vmatprep.subr.msk.bf16.mxu1 %vm622_vm0, %v1451_v52 }
  0x50   : > { %1328 = vmatpush3.bf16.xpose.msra.mxu0 %v657_v57 }
  0x51   : > { %1354 = vmatpush3.bf16.xpose.msra.mxu1 %v705_v60  ;;  %1374 = vmatprep.subr.msk.bf16.mxu0 %vm622_vm0, %v1454_v58 }
  0x52   : > { %1382 = vmatprep.subr.msk.bf16.mxu1 %vm622_vm0, %v1455_v61 }
  0x58   : > { %1330 = vmatpush3.bf16.xpose.msra.mxu0 %v660_v0 }
  0x59   : > { %1356 = vmatpush3.bf16.xpose.msra.mxu1 %v708_v3 }
  0x5f   : > { %1332 = vmatmul.mubr.msk.bf16.vlgmr.msra.gmra.mrb[0].mxu0 %vm622_vm0, %v1625_v1 }
  0x60   : > { %1358 = vmatmul.mubr.msk.bf16.vlgmr.msra.gmra.mrb[0].mxu1 %vm622_vm0, %v1625_v1  ;;  %1333 = vmatprep.mubr.msk.bf16.mxu0 %vm622_vm0, %v1459_v4  ;;  %v1461_v1 = vld [vmem:[%s1834_s1 + $0x18] sm:$0xff]  }
  0x61   : > { %1359 = vmatprep.mubr.msk.bf16.mxu1 %vm622_vm0, %v1459_v4 }
  0x67   : > { %1334 = vmatmul.mubr.msk.bf16.gmra.mrb[4].mxu0 %vm622_vm0, %v1459_v4 }
  0x68   : > { %1360 = vmatmul.mubr.msk.bf16.gmra.mrb[4].mxu1 %vm622_vm0, %v1459_v4  ;;  %1335 = vmatprep.mubr.msk.bf16.mxu0 %vm622_vm0, %v1460_v5 }
  0x69   : > { %1361 = vmatprep.mubr.msk.bf16.mxu1 %vm622_vm0, %v1460_v5 }
  0x6f   : > { %1336 = vmatmul.mubr.msk.bf16.gmra.mrb[8].mxu0 %vm622_vm0, %v1460_v5 }
  0x70   : > { %1362 = vmatmul.mubr.msk.bf16.gmra.mrb[8].mxu1 %vm622_vm0, %v1460_v5  ;;  %1337 = vmatprep.mubr.msk.bf16.mxu0 %vm622_vm0, %v1461_v1 }
  0x71   : > { %1363 = vmatprep.mubr.msk.bf16.mxu1 %vm622_vm0, %v1461_v1 }
  0x77   : > { %1338 = vmatmul.mubr.msk.bf16.gmra.mrb[12].mxu0 %vm622_vm0, %v1461_v1 }
  0x78   : > { %1364 = vmatmul.mubr.msk.bf16.gmra.mrb[12].mxu1 %vm622_vm0, %v1461_v1  ;;  %1339 = vmatprep.mubr.msk.bf16.mxu0 %vm622_vm0, %v1462_v6 }
  0x79   : > { %1365 = vmatprep.mubr.msk.bf16.mxu1 %vm622_vm0, %v1462_v6 }
  0x7f   : > { %1340 = vmatmul.mubr.msk.bf16.gmra.mrb[16].mxu0 %vm622_vm0, %v1462_v6 }
  0x80   : > { %1366 = vmatmul.mubr.msk.bf16.gmra.mrb[16].mxu1 %vm622_vm0, %v1462_v6  ;;  %1015 = vmatprep.mubr.bf16.mxu0 %v1528_v2 }
  0x81   : > { %1058 = vmatprep.mubr.bf16.mxu1 %v1528_v2 }
  0x92   : > { %v390_v7 = vpop.permute.xlu0 %389  ;;  %v400_v8 = vpop.permute.xlu1 %399 }
  0x96   : > { %v395_v9 = vpop.permute.xlu0 %394  ;;  %v405_v34 = vpop.permute.xlu1 %404 }
  0x9a   : > { %v410_v60 = vpop.permute.xlu0 %409  ;;  %v415_v0 = vpop.permute.xlu1 %414 }
 0x132   : > { %v768_v10 = vpop.f32.mrb[0].mxu0 }
 0x133   : > { %v769_v11 = vadd.f32 %v768_v10, %v390_v7  ;;  %v851_v12 = vpop.f32.mrb[0].mxu1  ;;  %v770_v13 = vpop.f32.mrb[1].mxu0 }
 0x134   : > { %v852_v14 = vadd.f32 %v851_v12, %v390_v7  ;;  %v771_v15 = vadd.f32 %v770_v13, %v390_v7  ;;  %v853_v16 = vpop.f32.mrb[1].mxu1  ;;  %v772_v17 = vpop.f32.mrb[2].mxu0 }
 0x135   : > { %v854_v18 = vadd.f32 %v853_v16, %v390_v7  ;;  %v773_v19 = vadd.f32 %v772_v17, %v395_v9  ;;  %v855_v20 = vpop.f32.mrb[2].mxu1  ;;  %v774_v21 = vpop.f32.mrb[3].mxu0  ;;  %v900_v25 = vmax.f32 %v769_v11, 0.0 }
 0x136   : > { %v856_v22 = vadd.f32 %v855_v20, %v395_v9  ;;  %v775_v23 = vadd.f32 %v774_v21, %v395_v9  ;;  %v857_v24 = vpop.f32.mrb[3].mxu1  ;;  %v902_v27 = vmax.f32 %v852_v14, 0.0  ;;  %v901_v28 = vmax.f32 %v771_v15, 0.0 }
 0x137   : > { %v904_v2 = vmax.f32 %v773_v19, 0.0  ;;  %v858_v26 = vadd.f32 %v857_v24, %v395_v9  ;;  %v903_v31 = vmax.f32 %v854_v18, 0.0 }
 0x138   : > { %v906_v29 = vmax.f32 %v856_v22, 0.0  ;;  %v905_v30 = vmax.f32 %v775_v23, 0.0 }
 0x139   : > { %v940_v32 = vpack.c.bf16 %v904_v2, %v900_v25  ;;  %v907_v33 = vmax.f32 %v858_v26, 0.0  ;;  %v420_v26 = vpop.permute.xlu0 %419 }
 0x13a   : > { %v942_v35 = vpack.c.bf16 %v906_v29, %v902_v27  ;;  %v941_v36 = vpack.c.bf16 %v905_v30, %v901_v28  ;;  %v778_v37 = vpop.f32.mrb[4].mxu0  ;;  %v425_v30 = vpop.permute.xlu1 %424 }
 0x13b   : > { %v943_v38 = vpack.c.bf16 %v907_v33, %v903_v31  ;;  %v779_v39 = vadd.f32 %v778_v37, %v400_v8  ;;  %v861_v40 = vpop.f32.mrb[4].mxu1  ;;  %v780_v41 = vpop.f32.mrb[5].mxu0 }
 0x13c   : > { %v862_v42 = vadd.f32 %v861_v40, %v400_v8  ;;  %v781_v43 = vadd.f32 %v780_v41, %v400_v8  ;;  %v863_v44 = vpop.f32.mrb[5].mxu1  ;;  %v782_v45 = vpop.f32.mrb[6].mxu0  ;;  %983 = vmatprep.subr.bf16.mxu0 %v941_v36 }
 0x13d   : > { %v864_v46 = vadd.f32 %v863_v44, %v400_v8  ;;  %v783_v47 = vadd.f32 %v782_v45, %v405_v34  ;;  %v865_v48 = vpop.f32.mrb[6].mxu1  ;;  %1026 = vmatprep.subr.bf16.mxu1 %v943_v38  ;;  %v784_v49 = vpop.f32.mrb[7].mxu0  ;;  %984 = vmatpush1.bf16.msra.mxu0 %v940_v32  ;;  %v908_v53 = vmax.f32 %v779_v39, 0.0 }
 0x13e   : > { %v866_v50 = vadd.f32 %v865_v48, %v405_v34  ;;  %v785_v51 = vadd.f32 %v784_v49, %v405_v34  ;;  %v867_v52 = vpop.f32.mrb[7].mxu1  ;;  %1027 = vmatpush1.bf16.msra.mxu1 %v942_v35  ;;  %v910_v56 = vmax.f32 %v862_v42, 0.0  ;;  %v909_v57 = vmax.f32 %v781_v43, 0.0 }
 0x13f   : > { %v912_v54 = vmax.f32 %v783_v47, 0.0  ;;  %v868_v55 = vadd.f32 %v867_v52, %v405_v34  ;;  %v911_v61 = vmax.f32 %v864_v46, 0.0 }
 0x140   : > { %v914_v58 = vmax.f32 %v866_v50, 0.0  ;;  %v913_v59 = vmax.f32 %v785_v51, 0.0 }
 0x141   : > { %v944_v62 = vpack.c.bf16 %v912_v54, %v908_v53  ;;  %v915_v63 = vmax.f32 %v868_v55, 0.0 }
 0x142   : > { %v946_v3 = vpack.c.bf16 %v914_v58, %v910_v56  ;;  %v945_v4 = vpack.c.bf16 %v913_v59, %v909_v57  ;;  %v788_v5 = vpop.f32.mrb[8].mxu0  ;;  %v430_v56 = vpop.permute.xlu0 %429 }
 0x143   : > { %v947_v1 = vpack.c.bf16 %v915_v63, %v911_v61  ;;  %v789_v6 = vadd.f32 %v788_v5, %v410_v60  ;;  %v871_v7 = vpop.f32.mrb[8].mxu1  ;;  %v790_v8 = vpop.f32.mrb[9].mxu0 }
 0x144   : > { %v872_v9 = vadd.f32 %v871_v7, %v410_v60  ;;  %v791_v10 = vadd.f32 %v790_v8, %v410_v60  ;;  %v873_v11 = vpop.f32.mrb[9].mxu1  ;;  %v792_v12 = vpop.f32.mrb[10].mxu0  ;;  %985 = vmatprep.subr.bf16.mxu0 %v945_v4 }
 0x145   : > { %v874_v13 = vadd.f32 %v873_v11, %v410_v60  ;;  %v793_v14 = vadd.f32 %v792_v12, %v415_v0  ;;  %v875_v15 = vpop.f32.mrb[10].mxu1  ;;  %1028 = vmatprep.subr.bf16.mxu1 %v947_v1  ;;  %v794_v16 = vpop.f32.mrb[11].mxu0  ;;  %986 = vmatpush1.bf16.msra.mxu0 %v944_v62  ;;  %v916_v20 = vmax.f32 %v789_v6, 0.0 }
 0x146   : > { %v876_v17 = vadd.f32 %v875_v15, %v415_v0  ;;  %v795_v18 = vadd.f32 %v794_v16, %v415_v0  ;;  %v877_v19 = vpop.f32.mrb[11].mxu1  ;;  %1029 = vmatpush1.bf16.msra.mxu1 %v946_v3  ;;  %v918_v23 = vmax.f32 %v872_v9, 0.0  ;;  %v917_v24 = vmax.f32 %v791_v10, 0.0  ;;  %v435_v60 = vpop.permute.xlu1 %434 }
 0x147   : > { %v920_v21 = vmax.f32 %v793_v14, 0.0  ;;  %v878_v22 = vadd.f32 %v877_v19, %v415_v0  ;;  %v919_v27 = vmax.f32 %v874_v13, 0.0 }
 0x148   : > { %v922_v25 = vmax.f32 %v876_v17, 0.0  ;;  %v921_v2 = vmax.f32 %v795_v18, 0.0 }
 0x149   : > { %v948_v28 = vpack.c.bf16 %v920_v21, %v916_v20  ;;  %v923_v29 = vmax.f32 %v878_v22, 0.0 }
 0x14a   : > { %v950_v31 = vpack.c.bf16 %v922_v25, %v918_v23  ;;  %v949_v32 = vpack.c.bf16 %v921_v2, %v917_v24  ;;  %v798_v33 = vpop.f32.mrb[12].mxu0 }
 0x14b   : > { %v951_v34 = vpack.c.bf16 %v923_v29, %v919_v27  ;;  %v799_v35 = vadd.f32 %v798_v33, %v420_v26  ;;  %v881_v36 = vpop.f32.mrb[12].mxu1  ;;  %v800_v37 = vpop.f32.mrb[13].mxu0 }
 0x14c   : > { %v882_v38 = vadd.f32 %v881_v36, %v420_v26  ;;  %v801_v39 = vadd.f32 %v800_v37, %v420_v26  ;;  %v883_v40 = vpop.f32.mrb[13].mxu1  ;;  %v802_v41 = vpop.f32.mrb[14].mxu0  ;;  %987 = vmatprep.subr.bf16.mxu0 %v949_v32 }
 0x14d   : > { %v884_v42 = vadd.f32 %v883_v40, %v420_v26  ;;  %v803_v43 = vadd.f32 %v802_v41, %v425_v30  ;;  %v885_v44 = vpop.f32.mrb[14].mxu1  ;;  %1030 = vmatprep.subr.bf16.mxu1 %v951_v34  ;;  %v804_v45 = vpop.f32.mrb[15].mxu0  ;;  %988 = vmatpush1.bf16.msra.mxu0 %v948_v28  ;;  %v924_v49 = vmax.f32 %v799_v35, 0.0  ;;  %v1463_v28 = vld [vmem:[%s1836_s3] sm:$0x1f]  }
 0x14e   : > { %v886_v46 = vadd.f32 %v885_v44, %v425_v30  ;;  %v805_v47 = vadd.f32 %v804_v45, %v425_v30  ;;  %v887_v48 = vpop.f32.mrb[15].mxu1  ;;  %1031 = vmatpush1.bf16.msra.mxu1 %v950_v31  ;;  %v926_v52 = vmax.f32 %v882_v38, 0.0  ;;  %v925_v53 = vmax.f32 %v801_v39, 0.0  ;;  %v972_v29 = vpop.permute.xlu0 %971 }
 0x14f   : > { %v928_v50 = vmax.f32 %v803_v43, 0.0  ;;  %v888_v51 = vadd.f32 %v887_v48, %v425_v30  ;;  %v927_v57 = vmax.f32 %v884_v42, 0.0  ;;  %v967_v30 = vpop.permute.xlu1 %966 }
 0x150   : > { %v930_v54 = vmax.f32 %v886_v46, 0.0  ;;  %v929_v55 = vmax.f32 %v805_v47, 0.0 }
 0x151   : > { %v952_v58 = vpack.c.bf16 %v928_v50, %v924_v49  ;;  %v931_v59 = vmax.f32 %v888_v51, 0.0 }
 0x152   : > { %v954_v61 = vpack.c.bf16 %v930_v54, %v926_v52  ;;  %v953_v62 = vpack.c.bf16 %v929_v55, %v925_v53  ;;  %v808_v63 = vpop.f32.mrb[16].mxu0  ;;  %v1087_v51 = vpop.permute.xlu0 %1086 }
 0x153   : > { %v955_v0 = vpack.c.bf16 %v931_v59, %v927_v57  ;;  %v809_v3 = vadd.f32 %v808_v63, %v430_v56  ;;  %v891_v4 = vpop.f32.mrb[16].mxu1  ;;  %v810_v5 = vpop.f32.mrb[17].mxu0 }
 0x154   : > { %v892_v1 = vadd.f32 %v891_v4, %v430_v56  ;;  %v811_v6 = vadd.f32 %v810_v5, %v430_v56  ;;  %v893_v7 = vpop.f32.mrb[17].mxu1  ;;  %v812_v8 = vpop.f32.mrb[18].mxu0  ;;  %989 = vmatprep.subr.bf16.mxu0 %v953_v62 }
 0x155   : > { %v894_v9 = vadd.f32 %v893_v7, %v430_v56  ;;  %v813_v10 = vadd.f32 %v812_v8, %v435_v60  ;;  %v895_v11 = vpop.f32.mrb[18].mxu1  ;;  %1032 = vmatprep.subr.bf16.mxu1 %v955_v0  ;;  %v814_v12 = vpop.f32.mrb[19].mxu0  ;;  %990 = vmatpush1.bf16.msra.mxu0 %v952_v58  ;;  %v932_v16 = vmax.f32 %v809_v3, 0.0  ;;  %v1136_v58 = vlaneseq }
 0x156   : > { %v896_v13 = vadd.f32 %v895_v11, %v435_v60  ;;  %v815_v14 = vadd.f32 %v814_v12, %v435_v60  ;;  %v897_v15 = vpop.f32.mrb[19].mxu1  ;;  %1033 = vmatpush1.bf16.msra.mxu1 %v954_v61  ;;  %v934_v19 = vmax.f32 %v892_v1, 0.0  ;;  %v933_v20 = vmax.f32 %v811_v6, 0.0  ;;  %v1082_v55 = vpop.permute.xlu1 %1081 }
 0x157   : > { %v936_v17 = vmax.f32 %v813_v10, 0.0  ;;  %v898_v18 = vadd.f32 %v897_v15, %v435_v60  ;;  %v935_v23 = vmax.f32 %v894_v9, 0.0  ;;  %vm1175_vm3 = vcmp.lt.s32.totalorder %v1136_v58, 512 }
 0x158   : > { %v938_v21 = vmax.f32 %v896_v13, 0.0  ;;  %v937_v22 = vmax.f32 %v815_v14, 0.0  ;;  %v1137_v14 = vshrl.u32 %v1136_v58, 7 }
 0x159   : > { %v956_v24 = vpack.c.bf16 %v936_v17, %v932_v16  ;;  %v939_v25 = vmax.f32 %v898_v18, 0.0 }
 0x15a   : > { %v958_v2 = vpack.c.bf16 %v938_v21, %v934_v19  ;;  %v957_v26 = vpack.c.bf16 %v937_v22, %v933_v20  ;;  %v1529_v21 = vmov 1966171168  }
 0x15b   : > { %v959_v27 = vpack.c.bf16 %v939_v25, %v935_v23  ;;  %v1151_v22 = vunpack.c.l.s4 %v1529_v21  ;;  %v1138_v25 = vsub.s32 0, %v1137_v14 }
 0x15c   : > { %991 = vmatprep.subr.bf16.mxu0 %v957_v26 }
 0x15d   : > { %1034 = vmatprep.subr.bf16.mxu1 %v959_v27  ;;  %992 = vmatpush1.bf16.msra.mxu0 %v956_v24  ;;  %v1134_v27 = vpop.permute.xlu0 %1133 }
 0x15e   : > { %1035 = vmatpush1.bf16.msra.mxu1 %v958_v2 }
 0x160   : > { %1307 = vmatmul.mubr.msk.bf16.vlgmr.msra.gmra.mrb[20].mxu0 %vm979_vm1, %v1463_v28 }
 0x161   : > { %1308 = vmatmul.mubr.msk.bf16.vlgmr.msra.gmra.mrb[20].mxu1 %vm979_vm1, %v1463_v28 }
 0x233   : > { %v1017_v31 = vpop.f32.mrb[20].mxu0 }
 0x234   : > { %v1018_v32 = vadd.f32 %v1017_v31, %v967_v30  ;;  %v1060_v33 = vpop.f32.mrb[20].mxu1  ;;  %v1019_v34 = vpop.f32.mrb[21].mxu0 }
 0x235   : > { %v1061_v35 = vadd.f32 %v1060_v33, %v967_v30  ;;  %v1020_v36 = vadd.f32 %v1019_v34, %v967_v30  ;;  %v1062_v37 = vpop.f32.mrb[21].mxu1  ;;  %v1021_v38 = vpop.f32.mrb[22].mxu0 }
 0x236   : > { %v1063_v39 = vadd.f32 %v1062_v37, %v967_v30  ;;  %v1022_v40 = vadd.f32 %v1021_v38, %v972_v29  ;;  %v1064_v41 = vpop.f32.mrb[22].mxu1  ;;  %v1023_v42 = vpop.f32.mrb[23].mxu0  ;;  %v1069_v43 = vmax.f32 %v1018_v32, 0.0  ;;  %v1152_v32 = vunpack.c.0.s8 %v1151_v22 }
 0x237   : > { %v1065_v44 = vadd.f32 %v1064_v41, %v972_v29  ;;  %v1024_v45 = vadd.f32 %v1023_v42, %v972_v29  ;;  %v1066_v46 = vpop.f32.mrb[23].mxu1  ;;  %v1071_v47 = vmax.f32 %v1061_v35, 0.0  ;;  %v1070_v48 = vmax.f32 %v1020_v36, 0.0 }
 0x238   : > { %v1073_v49 = vmax.f32 %v1022_v40, 0.0  ;;  %v1067_v50 = vadd.f32 %v1066_v46, %v972_v29  ;;  %v1072_v52 = vmax.f32 %v1063_v39, 0.0  ;;  %v1089_v59 = vmul.f32 %v1082_v55, %v1069_v43 }
 0x239   : > { %v1075_v53 = vmax.f32 %v1065_v44, 0.0  ;;  %v1074_v54 = vmax.f32 %v1024_v45, 0.0  ;;  %v1091_v62 = vmul.f32 %v1082_v55, %v1071_v47  ;;  %v1090_v63 = vmul.f32 %v1082_v55, %v1070_v48 }
 0x23a   : > { %v1093_v56 = vmul.f32 %v1087_v51, %v1073_v49  ;;  %v1076_v57 = vmax.f32 %v1067_v50, 0.0  ;;  %v1092_v4 = vmul.f32 %v1082_v55, %v1072_v52  ;;  %v1139_v35 = vrot.slane %v1134_v27, %v1138_v25 }
 0x23b   : > { %v1095_v60 = vmul.f32 %v1087_v51, %v1075_v53  ;;  %v1094_v61 = vmul.f32 %v1087_v51, %v1074_v54  ;;  %v1155_v42 = vsub.s32 %v1152_v32, %v1137_v14 }
 0x23c   : > { %v1098_v0 = vsel %vm1097_vm2, %v1093_v56, 0.0  ;;  %v1096_v3 = vmul.f32 %v1087_v51, %v1076_v57 }
 0x23d   : > { %v1099_v5 = vadd.f32 %v1098_v0, %v1089_v59  ;;  %v1114_v1 = vsel %vm1097_vm2, %v1095_v60, 0.0  ;;  %v1106_v6 = vsel %vm1097_vm2, %v1094_v61, 0.0 }
 0x23e   : > { %v1115_v7 = vadd.f32 %v1114_v1, %v1091_v62  ;;  %v1107_v8 = vadd.f32 %v1106_v6, %v1090_v63  ;;  %v1122_v9 = vsel %vm1097_vm2, %v1096_v3, 0.0 }
 0x23f   : > { %v1100_v10 = vrot.slane %v1099_v5, 4  ;;  %v1123_v11 = vadd.f32 %v1122_v9, %v1092_v4 }
 0x240   : > { %v1116_v12 = vrot.slane %v1115_v7, 4  ;;  %v1108_v13 = vrot.slane %v1107_v8, 4 }
 0x241   : > { %v1101_v15 = vadd.f32 %v1100_v10, %v1099_v5  ;;  %v1124_v16 = vrot.slane %v1123_v11, 4 }
 0x242   : > { %v1117_v17 = vadd.f32 %v1116_v12, %v1115_v7  ;;  %v1109_v18 = vadd.f32 %v1108_v13, %v1107_v8 }
 0x243   : > { %v1102_v19 = vrot.slane %v1101_v15, 2  ;;  %v1125_v20 = vadd.f32 %v1124_v16, %v1123_v11 }
 0x244   : > { %v1118_v23 = vrot.slane %v1117_v17, 2  ;;  %v1110_v24 = vrot.slane %v1109_v18, 2 }
 0x245   : > { %v1103_v2 = vadd.f32 %v1102_v19, %v1101_v15  ;;  %v1126_v26 = vrot.slane %v1125_v20, 2 }
 0x246   : > { %v1119_v28 = vadd.f32 %v1118_v23, %v1117_v17  ;;  %v1111_v29 = vadd.f32 %v1110_v24, %v1109_v18 }
 0x247   : > { %v1104_v30 = vrot.slane %v1103_v2, 1  ;;  %v1127_v31 = vadd.f32 %v1126_v26, %v1125_v20 }
 0x248   : > { %v1120_v33 = vrot.slane %v1119_v28, 1  ;;  %v1112_v34 = vrot.slane %v1111_v29, 1 }
 0x249   : > { %v1105_v36 = vadd.f32 %v1104_v30, %v1103_v2  ;;  %v1128_v37 = vrot.slane %v1127_v31, 1 }
 0x24a   : > { %v1121_v38 = vadd.f32 %v1120_v33, %v1119_v28  ;;  %v1113_v39 = vadd.f32 %v1112_v34, %v1111_v29 }
 0x24b   : > { %v1140_v40 = vadd.f32 %v1139_v35, %v1105_v36  ;;  %v1129_v41 = vadd.f32 %v1128_v37, %v1127_v31 }
 0x24c   : > { %v1142_v43 = vadd.f32 %v1139_v35, %v1121_v38  ;;  %v1141_v44 = vadd.f32 %v1139_v35, %v1113_v39 }
 0x24d   : > { %v1143_v45 = vadd.f32 %v1139_v35, %v1129_v41 }
 0x24e   : > { %v1148_v46 = vcombine.low %v1140_v40, %v1141_v44 }
 0x24f   : > { %v1149_v47 = vcombine.low %v1142_v43, %v1143_v45 }
 0x250   : > { %v1156_v48 = vrot.slane %v1148_v46, %v1155_v42 }
 0x251   : > { %v1163_v49 = vrot.slane %v1149_v47, %v1155_v42 }
 0x253   : > { %v1164_v50 = vcombine.low %v1156_v48, %v1163_v49 }
 0x255   : > { %v1171_v51 = vrot.slane %v1164_v50, %v1155_v42 }
 0x257   : > { %1177 = vst.msk [vmem:[%s286_s18] sm:$0xf] %vm1175_vm3, %v1171_v51 }
 0x258   : > { %1477 = shalt.err (!%p1474_p3)
}
 0x259   : > { %s1478_s14 = scalar_lea.hbm %s1791_s22, 64  ;;  %s1482_s15 = scalar_lea.hbm %s1840_s7, 128 }
 0x25a   : > { %p1479_p4 = scmp.ne.s32.totalorder %s1791_s22, %s1478_s14  ;;  %p1483_p9 = scmp.lt.u32.totalorder %s1791_s22, %s1840_s7 }
 0x25b   : > { %p1484_p10 = scmp.lt.u32.totalorder %s1482_s15, %s1478_s14  ;;  %p1486_p12 = scmp.lt.u32.totalorder %s1478_s14, %s1791_s22 }
 0x25c   : > { %p1480_p7 = pnand %p1479_p4, %p1609_p5 }
 0x25d   : > { %p1485_p11 = por %p1484_p10, %p1483_p9 }
 0x25e   : > { %p1481_p8 = pneg %p1480_p7 }
 0x25f   : > { %p1487_p13 = por %p1486_p12, %p1485_p11 }
 0x261   : > { %p1488_p0 = pnand %p1487_p13, %p1481_p8 }
 0x263   : > { %1491 = shalt.err (!%p1488_p0)
}
 0x264   : > { %1383 = dma.vmem_to_hbm [thread:$0]  (%p1609_p5), %s1793_s19, 64, %s1791_s22, %s1179_s23  }
 0x265 PF: > { %p1389_p1 = scmp.ge.s32.totalorder %s1526_s29, 2  ;;  %s1205_s18 = sand.u32 1, %s1514_s26  }
 0x266   : > { %s1206_s20 = scalar_lea.sflag [#allocation4], %s1205_s18 }
 0x267   : > { %p1386_p2 = pnand %p1389_p1, %p1613_p6 }
 0x269   : > { %1509 = dma.done.wait (!%p1386_p2), %s1206_s20, 64  }
 0x26a   : > { %1511 = vsyncadd (!%p1386_p2), %s1206_s20, 4294967232  ;;  %p19_p3 = scmp.ge.s32.totalorder %s1597_s8, 4   ;;  %s1843_s26 = smov %s1518_s27 }
 0x26b   : > { %s1844_s27 = smov %s1522_s28  ;;  %s1845_s28 = smov %s1607_s11 }
 0x26c   : > { %s1846_s29 = smov %s1597_s8  ;;  %21 = sbr.rel (!%p19_p3) target bundleno = 6 (0x6), region = 83 }
 0x273   :  { %1211 = vsyncpa [#allocation4], 1 }
 0x274   :  { %1213 = vsyncpa [#allocation4 + $0x1], 1 }

</bundles_post_ra>
